<compile_context>
chip_gen: v7x
topology: tpu7x:2x2x1
jax: 0.10.0
libtpu: 0.0.40
codegen_flags: <defaults>
</compile_context>

<pallas_src>
import functools

import jax
import jax.numpy as jnp
from jax.experimental import pallas as pl
from jax.experimental.pallas import tpu as pltpu


def _mlp_silu_kernel(x_ref, w_ref, b_ref, o_ref):
    # x_ref: (tm_p, pd) input tile (f32 or bf16)
    # w_ref: (pd, pd) weight, (in, out) layout (block-diag of PyTorch W^T)
    # b_ref: (1, pd)  bias, f32
    y = jnp.dot(x_ref[...], w_ref[...], preferred_element_type=jnp.float32)
    y = y + b_ref[...]                       # f32 bias add
    # SiLU in f32 (f32 VPU/EUP path works on all generations incl. v5e).
    o_ref[...] = (y * jax.nn.sigmoid(y)).astype(o_ref.dtype)


def _round_up(x, m):
    return ((x + m - 1) // m) * m


def _sublane(dtype):
    # Second-minor block-dim multiple for a dtype: f32 -> 8, bf16 -> 16.
    return 32 // jnp.dtype(dtype).itemsize


@functools.partial(jax.jit, static_argnames=("tm", "compute_dtype", "out_dtype"))
def causal_branch_forward(x, weight, bias, *, tm=32768, compute_dtype=None,
                          out_dtype=None):
    """y = silu(x @ weight.T + bias).

    x: (..., D); weight: (D, D) in PyTorch (out, in) layout; bias: (D,).
    tm: target M tile in *original* rows.  compute_dtype: MXU operand dtype
    (e.g. jnp.bfloat16).  out_dtype: HBM output dtype (default x.dtype).
    """
    orig_shape = x.shape
    dims = orig_shape[-1]
    cdt = jnp.dtype(compute_dtype) if compute_dtype is not None else jnp.dtype(x.dtype)
    odt = jnp.dtype(out_dtype) if out_dtype is not None else jnp.dtype(x.dtype)

    x2d = x.reshape(-1, dims)
    m = x2d.shape[0]
    if m == 0:
        return jnp.zeros(orig_shape, dtype=odt)

    # ---- Lane densification: pack `pack` rows into one 128-lane row. -------
    pack = 128 // dims if (dims < 128 and 128 % dims == 0) else 1
    padded_m = _round_up(m, pack)
    if padded_m != m:
        # At most pack-1 rows; the M tile itself is NOT padded (ragged grid).
        x2d = jnp.pad(x2d, ((0, padded_m - m), (0, 0)))
    pd = dims * pack                 # packed feature width (128 when packed)
    mp = padded_m // pack            # packed row count

    xp = x2d.reshape(mp, pd).astype(cdt)
    w_t = weight.T                                           # (in, out)
    if pack > 1:
        w_t = jnp.kron(jnp.eye(pack, dtype=w_t.dtype), w_t)  # block-diag (pd, pd)
    w_t = w_t.astype(cdt)
    b2d = jnp.tile(bias.astype(jnp.float32), pack).reshape(1, pd)

    # ---- Tile sizing. -------------------------------------------------------
    in_b = jnp.dtype(cdt).itemsize
    out_b = jnp.dtype(odt).itemsize
    sub = max(_sublane(cdt), _sublane(odt))

    if mp <= sub:
        tm_p = mp                                     # block == full extent
    else:
        tm_p = max(sub, (tm // pack) // sub * sub)    # requested (packed rows)
        # Double-buffered x + out tiles capped at ~20 MiB of VMEM.
        budget_rows = max(sub, ((20 << 20) // (2 * pd * (in_b + out_b))) // sub * sub)
        tm_p = min(tm_p, budget_rows)
        # Give the v7x megacore >= 2 grid steps, but only if each step still
        # moves >= ~2 MiB of input; otherwise the split is pure step overhead
        # (and on single-TC v5e/v6e it never pays).
        half = _round_up(pl.cdiv(mp, 2), sub)
        min_split = _round_up(pl.cdiv(2 << 20, pd * in_b), sub)
        if half >= min_split:
            tm_p = min(tm_p, half)
        else:
            tm_p = min(tm_p, _round_up(mp, sub))

    grid = (pl.cdiv(mp, tm_p),)      # ragged grid: Pallas masks the edge block

    # Explicit VMEM budget: double-buffered x/out tiles + weight/bias buffers,
    # 2x headroom, capped below v7x's 64 MiB physical VMEM.
    est = (2 * tm_p * pd * in_b            # x tile, double buffered
           + 2 * tm_p * pd * out_b         # out tile, double buffered
           + 2 * pd * pd * in_b            # weight (pipeline buffers)
           + 2 * pd * 4)                   # bias
    vmem_limit = int(min(48 << 20, max(16 << 20, 2 * est)))

    outp = pl.pallas_call(
        _mlp_silu_kernel,
        out_shape=jax.ShapeDtypeStruct((mp, pd), odt),
        grid=grid,
        in_specs=[
            pl.BlockSpec((tm_p, pd), lambda i: (i, 0)),
            pl.BlockSpec((pd, pd), lambda i: (0, 0)),
            pl.BlockSpec((1, pd), lambda i: (0, 0)),
        ],
        out_specs=pl.BlockSpec((tm_p, pd), lambda i: (i, 0)),
        compiler_params=pltpu.CompilerParams(
            dimension_semantics=("parallel",),
            vmem_limit_bytes=vmem_limit,
        ),
    )(xp, w_t, b2d)

    out2d = outp.reshape(padded_m, dims)
    if padded_m != m:
        out2d = out2d[:m]
    return out2d.reshape(orig_shape)


def _reference(x, weight, bias):
    # Full-precision f32 reference (explicit HIGHEST so the XLA matmul does not
    # silently use reduced-precision MXU passes).
    y = jnp.einsum("...d,od->...o", x, weight,
                   precision=jax.lax.Precision.HIGHEST) + bias
    return y * jax.nn.sigmoid(y)


if __name__ == "__main__":
    key = jax.random.PRNGKey(0)
    k_x, k_w, k_b, k_x2, k_x3 = jax.random.split(key, 5)

    B, N, D = 2, 8, 32            # batch=2, seq=8, hidden=32
    x = jax.random.normal(k_x, (B, N, D), dtype=jnp.float32)

    # Deterministic parameter init (PyTorch Linear default-ish uniform range).
    bound = 1.0 / (D ** 0.5)
    weight = jax.random.uniform(k_w, (D, D), minval=-bound, maxval=bound,
                                dtype=jnp.float32)   # (out, in)
    bias = jax.random.uniform(k_b, (D,), minval=-bound, maxval=bound,
                              dtype=jnp.float32)

    # 1) f32 path, small M (single lane-dense block).
    out = jax.block_until_ready(causal_branch_forward(x, weight, bias))
    ref = _reference(x, weight, bias)
    assert jnp.allclose(out, ref, atol=1e-3, rtol=1e-3), "f32 mismatch vs reference"

    # 2) ragged M path (B*N = 15 -> 1 row of pack padding).
    x_ragged = jax.random.normal(k_x2, (3, 5, D), dtype=jnp.float32)
    out_r = jax.block_until_ready(causal_branch_forward(x_ragged, weight, bias))
    ref_r = _reference(x_ragged, weight, bias)
    assert jnp.allclose(out_r, ref_r, atol=1e-3, rtol=1e-3), "ragged-M mismatch"

    # 3) medium M: exercises the ragged-grid edge-block masking
    #    (a) default tile (single clipped block), (b) small tile (multi-step grid).
    x_mid = jax.random.normal(k_x3, (4, 500, D), dtype=jnp.float32)
    ref_m = _reference(x_mid, weight, bias)
    out_m = jax.block_until_ready(causal_branch_forward(x_mid, weight, bias))
    assert jnp.allclose(out_m, ref_m, atol=1e-3, rtol=1e-3), "mid-M mismatch"
    out_m2 = jax.block_until_ready(causal_branch_forward(x_mid, weight, bias, tm=512))
    assert jnp.allclose(out_m2, ref_m, atol=1e-3, rtol=1e-3), "multi-step grid mismatch"

    # 4) bf16 in / bf16 out path (f32 accumulate + f32 SiLU inside the kernel);
    #    looser tolerance, numerics are bf16-level by construction.
    out_bf = jax.block_until_ready(causal_branch_forward(
        x, weight, bias, compute_dtype=jnp.bfloat16, out_dtype=jnp.bfloat16))
    assert jnp.allclose(out_bf.astype(jnp.float32), ref, atol=5e-2, rtol=5e-2), \
        "bf16 mismatch"

    print("KERNEL_OK")
</pallas_src>

<mosaic_0001>
module attributes {stable_mosaic.version = 11 : i64} {
  func.func @_mlp_silu_kernel(%arg0: i32, %arg1: memref<4x128xf32, #tpu.memory_space<vmem>>, %arg2: memref<128x128xf32, #tpu.memory_space<vmem>>, %arg3: memref<1x128xf32, #tpu.memory_space<vmem>>, %arg4: memref<4x128xf32, #tpu.memory_space<vmem>>) attributes {dimension_semantics = [#tpu.dimension_semantics<parallel>], iteration_bounds = array<i64: 1>, scalar_prefetch = 0 : i64, scratch_operands = 0 : i64, tpu.core_type = #tpu.core_type<tc>, window_params = [{transform_indices = @transform_0, window_bounds = array<i64: 4, 128>}, {pipeline_mode = #tpu.pipeline_mode<synchronous>, transform_indices = @transform_1, window_bounds = array<i64: 128, 128>}, {pipeline_mode = #tpu.pipeline_mode<synchronous>, transform_indices = @transform_2, window_bounds = array<i64: 1, 128>}, {transform_indices = @transform_3, window_bounds = array<i64: 4, 128>}]} {
    %c0 = arith.constant 0 : index
    %c0_0 = arith.constant 0 : index
    %0 = vector.load %arg1[%c0, %c0_0] : memref<4x128xf32, #tpu.memory_space<vmem>>, vector<4x128xf32>
    %c0_1 = arith.constant 0 : index
    %c0_2 = arith.constant 0 : index
    %1 = vector.load %arg2[%c0_1, %c0_2] : memref<128x128xf32, #tpu.memory_space<vmem>>, vector<128x128xf32>
    %cst = arith.constant dense<0.000000e+00> : vector<4x128xf32>
    %2 = tpu.matmul %0, %1, %cst {dimension_numbers = #tpu.dot_dimension_numbers<[1], [0], [0], [1], [0, 0, 1, 1], [], []>} : vector<4x128xf32>, vector<128x128xf32>, vector<4x128xf32> -> vector<4x128xf32>
    %c0_3 = arith.constant 0 : index
    %c0_4 = arith.constant 0 : index
    %3 = vector.load %arg3[%c0_3, %c0_4] : memref<1x128xf32, #tpu.memory_space<vmem>>, vector<1x128xf32>
    %4 = vector.broadcast %3 : vector<1x128xf32> to vector<4x128xf32>
    %5 = arith.addf %2, %4 : vector<4x128xf32>
    %6 = arith.negf %5 : vector<4x128xf32>
    %7 = math.exp %6 : vector<4x128xf32>
    %cst_5 = arith.constant 1.000000e+00 : f32
    %8 = vector.broadcast %cst_5 : f32 to vector<4x128xf32>
    %9 = arith.addf %8, %7 : vector<4x128xf32>
    %10 = arith.divf %8, %9 : vector<4x128xf32>
    %11 = arith.mulf %5, %10 : vector<4x128xf32>
    %c0_6 = arith.constant 0 : index
    %c0_7 = arith.constant 0 : index
    %12 = vector.load %arg4[%c0_6, %c0_7] : memref<4x128xf32, #tpu.memory_space<vmem>>, vector<4x128xf32>
    tpu.vector_store %arg4[%c0_6, %c0_7], %11 {strides = array<i32>} : memref<4x128xf32, #tpu.memory_space<vmem>>, vector<4x128xf32>,
    return
  }
  func.func @transform_0(%arg0: i32) -> (i32, i32) {
    %c0_i32 = arith.constant 0 : i32
    %c0_i32_0 = arith.constant 0 : i32
    return %arg0, %c0_i32 : i32, i32
  }
  func.func @transform_1(%arg0: i32) -> (i32, i32) {
    %c0_i32 = arith.constant 0 : i32
    %c0_i32_0 = arith.constant 0 : i32
    %c0_i32_1 = arith.constant 0 : i32
    return %c0_i32, %c0_i32_0 : i32, i32
  }
  func.func @transform_2(%arg0: i32) -> (i32, i32) {
    %c0_i32 = arith.constant 0 : i32
    %c0_i32_0 = arith.constant 0 : i32
    %c0_i32_1 = arith.constant 0 : i32
    return %c0_i32, %c0_i32_0 : i32, i32
  }
  func.func @transform_3(%arg0: i32) -> (i32, i32) {
    %c0_i32 = arith.constant 0 : i32
    %c0_i32_0 = arith.constant 0 : i32
    return %arg0, %c0_i32 : i32, i32
  }
}

</mosaic_0001>

<bundles_post_ra>
// kernel: tile.8
= control target key start
LH: loop header
LB: loop body
LE: loop exit
PB: predicated region body
PF: predicated region fallthrough
CT: control target
= control target key end

     0   :  { %s22_s0 = inlined_call_operand.vmem [shape: f32[32], index: 0, kind: input, shape index: {}]   ;;  %s23_s1 = inlined_call_operand.vmem [shape: f32[4,32], index: 1, kind: output, shape index: {}]  }
   0x1   :  { %v4_v0 = vld [vmem:[%s22_s0] ss:$0 sm:$0xff] }
   0x2   :  { %5 = vst [vmem:[%s23_s1] sm:$0xf] %v4_v0 }

// kernel: tile.9
= control target key start
LH: loop header
LB: loop body
LE: loop exit
PB: predicated region body
PF: predicated region fallthrough
CT: control target
= control target key end

     0   :  { %vm7_vm0 = vcmask 261120   ;;  %s37_s8 = smov 32   ;;  %s38_s9 = smov 64   ;;  %vm13_vm1 = vcmask 1048320   ;;  %vm19_vm2 = vcmask 785920   ;;  %vm25_vm3 = vcmask 523520   ;;  %s55_s0 = inlined_call_operand.vmem [shape: f32[4,32], index: 0, kind: input, shape index: {}]   ;;  %s56_s1 = inlined_call_operand.vmem [shape: f32[1,128], index: 1, kind: output, shape index: {}]  }
   0x1   :  { %v4_v0 = vld [vmem:[%s55_s0] sm:$0xf]  ;;  %s36_s0 = smov 96  }
   0x2   :  { %5 = vst [vmem:[#allocation1] sm:$0xf] %v4_v0 }
   0x9   :  { %v10_v1 = vld [vmem:[#allocation1 + $0x3] sm:$0x1]   ;;  %v22_v2 = vld [vmem:[#allocation1 + $0x1] sm:$0x1]   ;;  %v6_v3 = vld [vmem:[#allocation1] sm:$0x1]  }
   0xa   :  { %11 = vrot.lane.b32.xlu0 %v10_v1, %s36_s0  ;;  %23 = vrot.lane.b32.xlu1 %v22_v2, %s37_s8  ;;  %v16_v4 = vld [vmem:[#allocation1 + $0x2] sm:$0x1]   ;;  %8 = vst.msk [vmem:[#allocation0] sm:$0x1] %vm7_vm0, %v6_v3  }
   0xe   :  { %17 = vrot.lane.b32.xlu0 %v16_v4, %s38_s9 }
  0x7c   :  { %v12_v5 = vpop.permute.xlu0 %11   ;;  %v24_v6 = vpop.permute.xlu1 %23  }
  0x7d   :  { %14 = vst.msk [vmem:[#allocation0] sm:$0x1] %vm13_vm1, %v12_v5  }
  0x80   :  { %v18_v7 = vpop.permute.xlu0 %17  }
  0x81   :  { %20 = vst.msk [vmem:[#allocation0] sm:$0x1] %vm19_vm2, %v18_v7  }
  0x82   :  { %26 = vst.msk [vmem:[#allocation0] sm:$0x1] %vm25_vm3, %v24_v6  }
  0x89   :  { %v30_v8 = vld [vmem:[#allocation0] sm:$0x1] }
  0x8a   :  { %32 = vst [vmem:[%s56_s1] sm:$0x1] %v30_v8 }

// kernel: causal_branch_forward.1
= control target key start
LH: loop header
LB: loop body
LE: loop exit
PB: predicated region body
PF: predicated region fallthrough
CT: control target
= control target key end

     0   :  { %v205_v0 = vmov 0.0|0.0   ;;  %vm206_vm0 = vmmov 0   ;;  %v207_v4 = vmov 0.0   ;;  %s285_s1 = inlined_call_operand.vmem [shape: f32[128,128], index: 1, kind: input, shape index: {}]   ;;  %s286_s0 = inlined_call_operand.vmem [shape: f32[4,128], index: 0, kind: input, shape index: {}]   ;;  %s287_s2 = inlined_call_operand.vmem [shape: f32[1,128], index: 2, kind: input, shape index: {}]   ;;  %s288_s3 = inlined_call_operand.vmem [shape: f32[4,128], index: 3, kind: output, shape index: {}]  }
   0x1   :  { %174 = vmatprep.subr.bf16.mxu0 %v205_v0  ;;  %v15_v1 = vld [vmem:[%s285_s1] sm:$0xff]  ;;  %v16_v2 = vld [vmem:[%s285_s1 + $0x8] sm:$0xff]  ;;  %v17_v3 = vld [vmem:[%s285_s1 + $0x10] sm:$0xff]  ;;  %171 = vmatprep.mubr.msk.f32.mxu0 %vm206_vm0, %v207_v4 }
   0x2   :  { %v175_v5 = vpack.c.bf16 %v16_v2, %v15_v1  ;;  %v18_v6 = vld [vmem:[%s285_s1 + $0x18] sm:$0xff]  ;;  %v19_v8 = vld [vmem:[%s285_s1 + $0x20] sm:$0xff]  ;;  %v20_v9 = vld [vmem:[%s285_s1 + $0x28] sm:$0xff] }
   0x3   :  { %v178_v7 = vpack.c.bf16 %v18_v6, %v17_v3  ;;  %v181_v10 = vpack.c.bf16 %v20_v9, %v19_v8  ;;  %v21_v11 = vld [vmem:[%s285_s1 + $0x30] sm:$0xff]  ;;  %v22_v12 = vld [vmem:[%s285_s1 + $0x38] sm:$0xff]  ;;  %v23_v14 = vld [vmem:[%s285_s1 + $0x40] sm:$0xff] }
   0x4   :  { %176 = vmatpush3.bf16.msra.mxu0 %v175_v5  ;;  %v184_v13 = vpack.c.bf16 %v22_v12, %v21_v11  ;;  %v24_v15 = vld [vmem:[%s285_s1 + $0x48] sm:$0xff]  ;;  %v25_v17 = vld [vmem:[%s285_s1 + $0x50] sm:$0xff]  ;;  %v26_v18 = vld [vmem:[%s285_s1 + $0x58] sm:$0xff] }
   0x5   :  { %177 = vmatprep.subr.bf16.mxu0 %v205_v0  ;;  %v187_v16 = vpack.c.bf16 %v24_v15, %v23_v14  ;;  %v190_v19 = vpack.c.bf16 %v26_v18, %v25_v17  ;;  %v27_v20 = vld [vmem:[%s285_s1 + $0x60] sm:$0xff]  ;;  %v28_v21 = vld [vmem:[%s285_s1 + $0x68] sm:$0xff]  ;;  %v29_v23 = vld [vmem:[%s285_s1 + $0x70] sm:$0xff] }
   0x6   :  { %v193_v22 = vpack.c.bf16 %v28_v21, %v27_v20  ;;  %v30_v24 = vld [vmem:[%s285_s1 + $0x78] sm:$0xff]  ;;  %v14_v26 = vld [vmem:[%s286_s0] sm:$0xf] }
   0x7   :  { %v196_v25 = vpack.c.bf16 %v30_v24, %v29_v23  ;;  %v120_v27 = vld [vmem:[%s287_s2] ss:$0 sm:$0xff] }
   0x8   :  { %179 = vmatpush3.bf16.msra.mxu0 %v178_v7 }
   0x9   :  { %180 = vmatprep.subr.bf16.mxu0 %v205_v0 }
   0xc   :  { %182 = vmatpush3.bf16.msra.mxu0 %v181_v10 }
   0xd   :  { %183 = vmatprep.subr.bf16.mxu0 %v205_v0 }
  0x10   :  { %185 = vmatpush3.bf16.msra.mxu0 %v184_v13 }
  0x11   :  { %186 = vmatprep.subr.bf16.mxu0 %v205_v0 }
  0x14   :  { %188 = vmatpush3.bf16.msra.mxu0 %v187_v16 }
  0x15   :  { %189 = vmatprep.subr.bf16.mxu0 %v205_v0 }
  0x18   :  { %191 = vmatpush3.bf16.msra.mxu0 %v190_v19 }
  0x19   :  { %192 = vmatprep.subr.bf16.mxu0 %v205_v0 }
  0x1c   :  { %194 = vmatpush3.bf16.msra.mxu0 %v193_v22 }
  0x1d   :  { %195 = vmatprep.subr.bf16.mxu0 %v205_v0 }
  0x20   :  { %197 = vmatpush3.bf16.msra.mxu0 %v196_v25 }
  0x23   :  { %172 = vmatmul.mubr.f32.vlgmr.msra.gmra.mrb[0].mxu0 %v14_v26 }
  0xf6   :  { %v104_v28 = vpop.f32.mrb[0].mxu0 }
  0xf7   :  { %v105_v29 = vadd.f32 %v120_v27, %v104_v28  ;;  %v173_v30 = vpop.f32.mrb[1].mxu0 }
  0xf9   :  { %v121_v31 = vmul.f32 -1.442695, %v105_v29 }
  0xfb   :  { %201 = vpow2.f32 %v121_v31 }
 0x105   :  { %v202_v32 = vpop.eup %201 }
 0x106   :  { %v111_v33 = vadd.f32 1.0, %v202_v32 }
 0x108   :  { %203 = vrcp.f32 %v111_v33 }
 0x112   :  { %v204_v34 = vpop.eup %203 }
 0x113   :  { %v114_v35 = vmul.f32 %v204_v34, %v105_v29 }
 0x115   :  { %115 = vst [vmem:[%s288_s3] sm:$0xf] %v114_v35 }

</bundles_post_ra>
